<compile_context>
chip_gen: v7x
topology: tpu7x:2x2x1
jax: 0.10.0
libtpu: 0.0.40
codegen_flags: <defaults>
</compile_context>

<pallas_src>
import functools

import jax
import jax.numpy as jnp
import numpy as np
from jax.experimental import pallas as pl
from jax.experimental.pallas import tpu as pltpu


def _sublane_tile(dtype) -> int:
    """Second-minor tiling granularity for a dtype (8 f32, 16 bf16, 32 int8)."""
    itemsize = jnp.dtype(dtype).itemsize
    return max(8, 32 // itemsize)


def _round_up(x: int, m: int) -> int:
    return ((x + m - 1) // m) * m


def _temporal_roll_kernel(x_cur_ref, x_prev_ref, y_next_ref, out_ref, *, fold):
    # Refs are (BB, 1, rows, c) VMEM tiles; squeeze the segment dim.
    xc = x_cur_ref[:, 0]    # (BB, l,    c)  x[b, t]
    xp = x_prev_ref[:, 0]   # (BB, hb_p, c)  x[b, (t-1) mod T], rows [0, hb_p)
    yn = y_next_ref[:, 0]   # (BB, hb_y, c)  y[b, (t+1) mod T], rows [l-hb_y, l)

    bb, l, c = xc.shape
    hb_p = xp.shape[1]
    hb_y = yn.shape[1]

    # Align the row bands with the full-l coordinate system. The zero padding
    # sits outside the selection masks below (concat boundaries are
    # sublane-aligned, so this is cheap register work on a mem-bound kernel).
    if hb_p < l:
        xp = jnp.concatenate(
            [xp, jnp.zeros((bb, l - hb_p, c), dtype=xp.dtype)], axis=1)
    if hb_y < l:
        yn = jnp.concatenate(
            [jnp.zeros((bb, l - hb_y, c), dtype=yn.dtype), yn], axis=1)

    row = jax.lax.broadcasted_iota(jnp.int32, (bb, l, c), 1)

    # Same effective write order as the PyTorch module: x everywhere (covers
    # token 0 and the middle band), then the x-prev band, then the y-next band
    # last (so y wins in any degenerate overlap, matching torch assignments).
    out = xc
    out = jnp.where((row >= 1) & (row <= fold), xp, out)
    out = jnp.where(row >= l - fold, yn, out)

    out_ref[:, 0] = out


def temporal_roll_v2(x, y, layer=0, *, n_segment=3, n_div=8, v=0,
                     target_block_bytes=2 * 1024 * 1024):
    """Pallas implementation of TemporalRoll_v2.forward (v == 0 branch)."""
    assert v == 0, "Only the default v==0 branch is implemented."
    nt, l, c = x.shape
    assert nt % n_segment == 0
    n_batch = nt // n_segment
    T = n_segment
    fold = l // n_div
    assert fold >= 1, "kernel assumes l >= n_div (fold >= 1)"

    x4 = x.reshape(n_batch, T, l, c)
    y4 = y.reshape(n_batch, T, l, c)

    sub = _sublane_tile(x.dtype)
    itemsize = jnp.dtype(x.dtype).itemsize

    # ---- band heights along the token (l / sublane) axis --------------------
    # x_prev: only rows 1..fold are consumed -> fetch rows [0, hb_p).
    hb_p = _round_up(fold + 1, sub)
    if hb_p >= l:
        hb_p = l

    # y_next: only the last `fold` rows are consumed -> fetch the last l-block
    # of height hb_y, where hb_y is the smallest sublane-aligned height that
    # covers the band and evenly divides l (so the block is anchored exactly at
    # the end). Fall back to a full-l block if no such height exists.
    hb_y = l
    cand = _round_up(fold, sub)
    while cand < l:
        if l % cand == 0:
            hb_y = cand
            break
        cand += sub
    kb_y = l // hb_y - 1  # block index of the last l-block (start = l - hb_y)

    # ---- batch blocking: amortize per-grid-step overhead ---------------------
    bytes_per_bt = l * c * itemsize
    bb = max(1, min(n_batch, target_block_bytes // max(bytes_per_bt, 1)))
    grid = (pl.cdiv(n_batch, bb), T)

    kernel = functools.partial(_temporal_roll_kernel, fold=fold)

    out4 = pl.pallas_call(
        kernel,
        out_shape=jax.ShapeDtypeStruct((n_batch, T, l, c), x.dtype),
        grid=grid,
        in_specs=[
            # x[b, t] : full (l, c) tile.
            pl.BlockSpec((bb, 1, l, c), lambda b, t: (b, t, 0, 0)),
            # x[b, (t-1) mod T] : leading row band only (torch.roll(x, +1, 1)).
            pl.BlockSpec((bb, 1, hb_p, c),
                         lambda b, t: (b, (t + T - 1) % T, 0, 0)),
            # y[b, (t+1) mod T] : trailing row band only (torch.roll(y, -1, 1)).
            pl.BlockSpec((bb, 1, hb_y, c),
                         lambda b, t: (b, (t + 1) % T, kb_y, 0)),
        ],
        out_specs=pl.BlockSpec((bb, 1, l, c), lambda b, t: (b, t, 0, 0)),
        compiler_params=pltpu.CompilerParams(
            dimension_semantics=("parallel", "parallel")
        ),
    )(x4, x4, y4)

    return out4.reshape(nt, l, c)


def _reference(x, y, *, n_segment=3, n_div=8):
    """Pure-JAX reference mirroring the PyTorch v==0 branch."""
    nt, l, c = x.shape
    nb = nt // n_segment
    x4 = x.reshape(nb, n_segment, l, c)
    y4 = y.reshape(nb, n_segment, l, c)
    fold = l // n_div
    out = jnp.zeros_like(x4)
    out = out.at[:, :, 0].set(x4[:, :, 0])
    out = out.at[:, :, 1:fold + 1].set(jnp.roll(x4[:, :, 1:fold + 1], 1, axis=1))
    out = out.at[:, :, l - fold:].set(jnp.roll(y4[:, :, l - fold:], -1, axis=1))
    out = out.at[:, :, 1 + fold:l - fold].set(x4[:, :, 1 + fold:l - fold])
    return out.reshape(nt, l, c)


def _run_case(key, n_batch, l, c, *, n_segment, n_div, target_block_bytes=None):
    nt = n_batch * n_segment
    kx, ky = jax.random.split(key)
    x = jax.random.normal(kx, (nt, l, c), dtype=jnp.float32)
    y = jax.random.normal(ky, (nt, l, c), dtype=jnp.float32)

    kwargs = dict(n_segment=n_segment, n_div=n_div, v=0)
    if target_block_bytes is not None:
        kwargs["target_block_bytes"] = target_block_bytes

    out = temporal_roll_v2(x, y, layer=0, **kwargs)
    out = jax.block_until_ready(out)

    ref = _reference(x, y, n_segment=n_segment, n_div=n_div)
    np.testing.assert_allclose(np.asarray(out), np.asarray(ref), rtol=0, atol=0)


if __name__ == "__main__":
    key = jax.random.PRNGKey(0)
    k1, k2 = jax.random.split(key)

    # Case 1: lane-dense channels, aligned bands, whole batch in one block.
    _run_case(k1, n_batch=4, l=64, c=256, n_segment=3, n_div=8)

    # Case 2: non-multiple-of-8 fold, partial batch edge block (bb=2 over 3).
    _run_case(k2, n_batch=3, l=40, c=128, n_segment=3, n_div=8,
              target_block_bytes=2 * 40 * 128 * 4)

    print("KERNEL_OK")
</pallas_src>

<mosaic_0001>
module attributes {stable_mosaic.version = 11 : i64} {
  func.func @_temporal_roll_kernel(%arg0: i32, %arg1: i32, %arg2: memref<4x1x64x256xf32, #tpu.memory_space<vmem>>, %arg3: memref<4x1x16x256xf32, #tpu.memory_space<vmem>>, %arg4: memref<4x1x8x256xf32, #tpu.memory_space<vmem>>, %arg5: memref<4x1x64x256xf32, #tpu.memory_space<vmem>>) attributes {dimension_semantics = [#tpu.dimension_semantics<parallel>, #tpu.dimension_semantics<parallel>], iteration_bounds = array<i64: 1, 3>, scalar_prefetch = 0 : i64, scratch_operands = 0 : i64, tpu.core_type = #tpu.core_type<tc>, window_params = [{transform_indices = @transform_0, window_bounds = array<i64: 4, 1, 64, 256>}, {transform_indices = @transform_1, window_bounds = array<i64: 4, 1, 16, 256>}, {transform_indices = @transform_2, window_bounds = array<i64: 4, 1, 8, 256>}, {transform_indices = @transform_3, window_bounds = array<i64: 4, 1, 64, 256>}]} {
    %c0 = arith.constant 0 : index
    %c0_0 = arith.constant 0 : index
    %c0_1 = arith.constant 0 : index
    %c0_2 = arith.constant 0 : index
    %0 = vector.load %arg2[%c0, %c0_0, %c0_1, %c0_2] : memref<4x1x64x256xf32, #tpu.memory_space<vmem>>, vector<4x1x64x256xf32>
    %1 = vector.shape_cast %0 : vector<4x1x64x256xf32> to vector<4x64x256xf32>
    %c0_3 = arith.constant 0 : index
    %c0_4 = arith.constant 0 : index
    %c0_5 = arith.constant 0 : index
    %c0_6 = arith.constant 0 : index
    %2 = vector.load %arg3[%c0_3, %c0_4, %c0_5, %c0_6] : memref<4x1x16x256xf32, #tpu.memory_space<vmem>>, vector<4x1x16x256xf32>
    %3 = vector.shape_cast %2 : vector<4x1x16x256xf32> to vector<4x16x256xf32>
    %c0_7 = arith.constant 0 : index
    %c0_8 = arith.constant 0 : index
    %c0_9 = arith.constant 0 : index
    %c0_10 = arith.constant 0 : index
    %4 = vector.load %arg4[%c0_7, %c0_8, %c0_9, %c0_10] : memref<4x1x8x256xf32, #tpu.memory_space<vmem>>, vector<4x1x8x256xf32>
    %5 = vector.shape_cast %4 : vector<4x1x8x256xf32> to vector<4x8x256xf32>
    %cst = arith.constant 0.000000e+00 : f32
    %6 = vector.broadcast %cst : f32 to vector<4x48x256xf32>
    %7 = tpu.concatenate %3, %6 in 1 : vector<4x16x256xf32>, vector<4x48x256xf32> -> vector<4x64x256xf32>
    %cst_11 = arith.constant 0.000000e+00 : f32
    %8 = vector.broadcast %cst_11 : f32 to vector<4x56x256xf32>
    %9 = tpu.concatenate %8, %5 in 1 : vector<4x56x256xf32>, vector<4x8x256xf32> -> vector<4x64x256xf32>
    %10 = tpu.iota {dimensions = array<i32: 1>} : vector<4x64x256xi32>
    %c1_i32 = arith.constant 1 : i32
    %11 = vector.broadcast %c1_i32 : i32 to vector<4x64x256xi32>
    %12 = arith.cmpi sge, %10, %11 : vector<4x64x256xi32>
    %c8_i32 = arith.constant 8 : i32
    %13 = vector.broadcast %c8_i32 : i32 to vector<4x64x256xi32>
    %14 = arith.cmpi sle, %10, %13 : vector<4x64x256xi32>
    %15 = arith.andi %12, %14 : vector<4x64x256xi1>
    %16 = arith.select %15, %7, %1 : vector<4x64x256xi1>, vector<4x64x256xf32>
    %c56_i32 = arith.constant 56 : i32
    %17 = vector.broadcast %c56_i32 : i32 to vector<4x64x256xi32>
    %18 = arith.cmpi sge, %10, %17 : vector<4x64x256xi32>
    %19 = arith.select %18, %9, %16 : vector<4x64x256xi1>, vector<4x64x256xf32>
    %c0_12 = arith.constant 0 : index
    %c0_13 = arith.constant 0 : index
    %c0_14 = arith.constant 0 : index
    %c0_15 = arith.constant 0 : index
    %20 = vector.load %arg5[%c0_12, %c0_13, %c0_14, %c0_15] : memref<4x1x64x256xf32, #tpu.memory_space<vmem>>, vector<4x1x64x256xf32>
    %21 = vector.shape_cast %20 : vector<4x1x64x256xf32> to vector<4x64x256xf32>
    %22 = vector.shape_cast %19 : vector<4x64x256xf32> to vector<4x1x64x256xf32>
    tpu.vector_store %arg5[%c0_12, %c0_13, %c0_14, %c0_15], %22 {strides = array<i32>} : memref<4x1x64x256xf32, #tpu.memory_space<vmem>>, vector<4x1x64x256xf32>,
    return
  }
  func.func @transform_0(%arg0: i32, %arg1: i32) -> (i32, i32, i32, i32) {
    %c0_i32 = arith.constant 0 : i32
    %c0_i32_0 = arith.constant 0 : i32
    %c0_i32_1 = arith.constant 0 : i32
    return %arg0, %arg1, %c0_i32, %c0_i32_0 : i32, i32, i32, i32
  }
  func.func @transform_1(%arg0: i32, %arg1: i32) -> (i32, i32, i32, i32) {
    %c3_i32 = arith.constant 3 : i32
    %0 = arith.addi %arg1, %c3_i32 : i32
    %c1_i32 = arith.constant 1 : i32
    %1 = arith.subi %0, %c1_i32 : i32
    %c3_i32_0 = arith.constant 3 : i32
    %c0_i32 = arith.constant 0 : i32
    %2 = arith.cmpi eq, %c3_i32_0, %c0_i32 : i32
    %c1_i32_1 = arith.constant 1 : i32
    %3 = arith.select %2, %c1_i32_1, %c3_i32_0 : i32
    %4 = arith.remsi %1, %3 : i32
    %c0_i32_2 = arith.constant 0 : i32
    %5 = arith.cmpi ne, %4, %c0_i32_2 : i32
    %c0_i32_3 = arith.constant 0 : i32
    %6 = arith.cmpi slt, %4, %c0_i32_3 : i32
    %c0_i32_4 = arith.constant 0 : i32
    %7 = arith.cmpi slt, %3, %c0_i32_4 : i32
    %8 = arith.xori %6, %7 : i1
    %9 = arith.andi %8, %5 : i1
    %10 = arith.addi %4, %3 : i32
    %11 = arith.select %9, %10, %4 : i32
    %c0_i32_5 = arith.constant 0 : i32
    %c0_i32_6 = arith.constant 0 : i32
    %c0_i32_7 = arith.constant 0 : i32
    return %arg0, %11, %c0_i32_5, %c0_i32_6 : i32, i32, i32, i32
  }
  func.func @transform_2(%arg0: i32, %arg1: i32) -> (i32, i32, i32, i32) {
    %c1_i32 = arith.constant 1 : i32
    %0 = arith.addi %arg1, %c1_i32 : i32
    %c3_i32 = arith.constant 3 : i32
    %c0_i32 = arith.constant 0 : i32
    %1 = arith.cmpi eq, %c3_i32, %c0_i32 : i32
    %c1_i32_0 = arith.constant 1 : i32
    %2 = arith.select %1, %c1_i32_0, %c3_i32 : i32
    %3 = arith.remsi %0, %2 : i32
    %c0_i32_1 = arith.constant 0 : i32
    %4 = arith.cmpi ne, %3, %c0_i32_1 : i32
    %c0_i32_2 = arith.constant 0 : i32
    %5 = arith.cmpi slt, %3, %c0_i32_2 : i32
    %c0_i32_3 = arith.constant 0 : i32
    %6 = arith.cmpi slt, %2, %c0_i32_3 : i32
    %7 = arith.xori %5, %6 : i1
    %8 = arith.andi %7, %4 : i1
    %9 = arith.addi %3, %2 : i32
    %10 = arith.select %8, %9, %3 : i32
    %c7_i32 = arith.constant 7 : i32
    %c0_i32_4 = arith.constant 0 : i32
    %c0_i32_5 = arith.constant 0 : i32
    return %arg0, %10, %c7_i32, %c0_i32_4 : i32, i32, i32, i32
  }
  func.func @transform_3(%arg0: i32, %arg1: i32) -> (i32, i32, i32, i32) {
    %c0_i32 = arith.constant 0 : i32
    %c0_i32_0 = arith.constant 0 : i32
    %c0_i32_1 = arith.constant 0 : i32
    return %arg0, %arg1, %c0_i32, %c0_i32_0 : i32, i32, i32, i32
  }
}

</mosaic_0001>

<bundles_post_ra>
// kernel: tpu_custom_call.1
= control target key start
LH: loop header
LB: loop body
LE: loop exit
PB: predicated region body
PF: predicated region fallthrough
CT: control target
= control target key end

     0   :  { %s1872_s0 = inlined_call_operand.hbm [shape: f32[4,3,64,256], index: 0, kind: input, shape index: {}]   ;;  %s1873_s1 = inlined_call_operand.hbm [shape: f32[4,3,64,256], index: 1, kind: input, shape index: {}]   ;;  %s1874_s2 = inlined_call_operand.hbm [shape: f32[4,3,64,256], index: 2, kind: input, shape index: {}]   ;;  %s1875_s3 = inlined_call_operand.hbm [shape: f32[4,3,64,256], index: 3, kind: output, shape index: {}]  }
   0x1   :  { %1889 = sst [smem:[#allocation32_spill]] %s1875_s3 }
   0x2   :  { %8 = vsyncpa [#allocation3], 0 }
   0x3   :  { %10 = vsyncpa [#allocation3 + $0x1], 0 }
   0x4   :  { %11 = vsyncpa [#allocation6], 0 }
   0x5   :  { %13 = vsyncpa [#allocation6 + $0x1], 0 }
   0x6   :  { %14 = vsyncpa [#allocation4], 0 }
   0x7   :  { %16 = vsyncpa [#allocation4 + $0x1], 0  ;;  %s1359_s12 = smov 0   ;;  %s1361_s13 = smov 0  }
   0x8   :  { %s1363_s14 = smov 0   ;;  %s1365_s15 = smov 0  }
   0x9   :  { %s1367_s16 = smov 0   ;;  %s1369_s17 = smov 0  }
   0xa   :  { %s1371_s18 = smov 0   ;;  %s1373_s19 = smov 0  }
   0xb   :  { %s1375_s20 = smov 0   ;;  %s1377_s21 = smov 0  }
   0xc   :  { %s1379_s22 = smov 0   ;;  %s1381_s23 = smov 0  }
   0xd LB: > { %1890 = sst [smem:[#allocation21_spill]] %s1294_s18  ;;  %s1420_s24 = sadd.s32 4294967295, %s1314_s23   ;;  %s1314_s23 = sphi %s1381_s23, %s22_s23   ;;  %s1310_s22 = sphi %s1379_s22, %s1926_s22   ;;  %s1306_s21 = sphi %s1377_s21, %s1925_s21   ;;  %s1302_s20 = sphi %s1375_s20, %s1924_s20   ;;  %s1298_s19 = sphi %s1373_s19, %s1934_s19   ;;  %s1294_s18 = sphi %s1371_s18, %s1933_s18   ;;  %s1290_s17 = sphi %s1369_s17, %s1932_s17   ;;  %s1286_s16 = sphi %s1367_s16, %s1931_s16   ;;  %s1282_s15 = sphi %s1365_s15, %s1930_s15   ;;  %s1278_s14 = sphi %s1363_s14, %s1929_s14   ;;  %s1274_s13 = sphi %s1361_s13, %s1928_s13   ;;  %s1270_s12 = sphi %s1359_s12, %s1927_s12  }
   0xe   : > { %1891 = sst [smem:[#allocation22_spill]] %s1302_s20  ;;  %s31_s25 = sadd.s32 1, %s1310_s22 }
   0xf   : > { %1892 = sst [smem:[#allocation23_spill]] %s1306_s21  ;;  %s43_s26 = sadd.s32 1, %s1302_s20 }
  0x10   : > { %1893 = sst [smem:[#allocation24_spill]] %s1310_s22  ;;  %p32_p0 = scmp.ge.s32.totalorder %s31_s25, 3 }
  0x11   : > { %p50_p1 = scmp.ne.s32.totalorder %s1302_s20, %s1298_s19  ;;  %p51_p2 = scmp.eq.s32.totalorder %s1314_s23, 0 }
  0x12   : > { %p1876_p3 = scmp.ne.s32.totalorder %s1298_s19, %s1294_s18  ;;  %p57_p5 = scmp.eq.s32.totalorder %s1420_s24, 0 }
  0x13   : > { %s1429_s27 = scalar_select %p32_p0, 0, %s31_s25  }
  0x14   : > { %p1436_p4 = por %p51_p2, %p50_p1  ;;  %s66_s30 = sadd.s32 2, %s1310_s22 }
  0x15   : > { %1894 = sst [smem:[#allocation25_spill]] %s1429_s27  ;;  %s39_s29 = ssub.s32 %s1310_s22, %s1429_s27 }
  0x16   : > { %p41_p6 = scmp.eq.s32.totalorder %s39_s29, 0  ;;  %p1449_p7 = por %p57_p5, %p1876_p3 }
  0x17   : > { %s68_s6 = ssub.s32 0, %s66_s30  ;;  %s80_s9 = sadd.s32 2, %s1429_s27 }
  0x18   : > { %s1455_s7 = scalar_select %p41_p6, %s1302_s20, %s43_s26  }
  0x19   : > { %s968_s8 = smin.u32 %s68_s6, %s66_s30  ;;  %s82_s10 = ssub.s32 0, %s80_s9 }
  0x1a   : > { %1897 = sst [smem:[#allocation26_spill]] %s1455_s7  ;;  %1167 = sdivrem.u32 %s968_s8, 3 }
  0x1b   : > { %s971_s11 = smin.u32 %s82_s10, %s80_s9  ;;  %p106_p8 = scmp.ne.s32.totalorder %s1290_s17, %s1286_s16 }
  0x1c   : > { %1169 = sdivrem.u32 %s971_s11, 3  ;;  %s99_s29 = sadd.s32 1, %s1290_s17 }
  0x1d   : > { %p112_p9 = scmp.ne.s32.totalorder %s1286_s16, %s1282_s15  ;;  %p1465_p10 = por %p106_p8, %p51_p2 }
  0x1e   : > { %s124_s5 = ssub.s32 0, %s31_s25  ;;  %s136_s6 = sadd.s32 1, %s1429_s27 }
  0x1f   : > { %p1471_p11 = por %p112_p9, %p57_p5  ;;  %s974_s30 = smin.u32 %s124_s5, %s31_s25 }
  0x20   : > { %1171 = sdivrem.u32 %s974_s30, 3  ;;  %s138_s8 = ssub.s32 0, %s136_s6 }
  0x21   : > { %s1899_s26 = scalar_select %p1471_p11, 1, 0 }
  0x22   : > { %s977_s10 = smin.u32 %s138_s8, %s136_s6  ;;  %p162_p13 = scmp.ne.s32.totalorder %s1278_s14, %s1274_s13 }
  0x23   : > { %s1168_s9 = spop.drf %1167  ;;  %1173 = sdivrem.u32 %s977_s10, 3 }
  0x24   : > { %p970_p12 = scmp.lt.s32.totalorder %s1168_s9, 0  ;;  %s78_s11 = sadd.s32 3, %s1168_s9 }
  0x25   : > { %s1170_s15 = spop.drf %1169  ;;  %p1482_p0 = por %p162_p13, %p51_p2 }
  0x26   : > { %s1936_s11 = smov (!%p970_p12, %s78_s11), %s1168_s9  ;;  %p973_p6 = scmp.lt.s32.totalorder %s1170_s15, 0 }
  0x27   : > { %s92_s5 = sadd.s32 3, %s1170_s15  ;;  %p168_p12 = scmp.ne.s32.totalorder %s1274_s13, %s1270_s12 }
  0x28   : > { %s1938_s5 = smov (!%p973_p6, %s92_s5), %s1170_s15  ;;  %p194_p13 = scmp.eq.s32.totalorder %s1420_s24, 2 }
  0x29   : > { %s1172_s7 = spop.drf %1171  ;;  %s95_s6 = ssub.s32 %s1936_s11, %s1938_s5 }
  0x2a   : > { %p97_p8 = scmp.eq.s32.totalorder %s95_s6, 0  ;;  %p976_p9 = scmp.lt.s32.totalorder %s1172_s7, 0 }
  0x2b   : > { %s134_s8 = sadd.s32 3, %s1172_s7  ;;  %p1496_p2 = por %p168_p12, %p57_p5 }
  0x2c   : > { %s1174_s30 = spop.drf %1173  ;;  %s1940_s8 = smov (!%p976_p9, %s134_s8), %s1172_s7 }
  0x2d   : > { %s1490_s9 = scalar_select %p97_p8, %s1290_s17, %s99_s29  }
  0x2e   : > { %s1902_s10 = scalar_select %p1496_p2, 1, 0 }
  0x2f   : > { %1901 = sst [smem:[#allocation27_spill]] %s1490_s9  ;;  %p979_p3 = scmp.lt.s32.totalorder %s1174_s30, 0 }
  0x30   : > { %1903 = sst [smem:[#allocation28_spill]] %s1902_s10  ;;  %s148_s15 = sadd.s32 3, %s1174_s30 }
  0x31   : > { %p1504_p6 = por %p194_p13, %p50_p1  ;;  %s1906_s6 = sadd.s32 4294967294, %s1314_s23  }
  0x32   : > { %p200_p11 = scmp.eq.s32.totalorder %s1906_s6, 2  ;;  %s1942_s15 = smov (!%p979_p3, %s148_s15), %s1174_s30 }
  0x33   : > { %s1904_s5 = scalar_select %p1504_p6, 1, 0 }
  0x34   : > { %p1907_p8 = scmp.ne.s32.totalorder %s1298_s19, %s1294_s18  ;;  %s151_s7 = ssub.s32 %s1940_s8, %s1942_s15 }
  0x35   : > { %1905 = sst [smem:[#allocation29_spill]] %s1904_s5  ;;  %s155_s29 = sadd.s32 1, %s1278_s14 }
  0x36   : > { %p1513_p9 = por %p200_p11, %p1907_p8  ;;  %p153_p5 = scmp.eq.s32.totalorder %s151_s7, 0 }
  0x37   : > { %p981_p12 = scmp.ge.s32.totalorder %s1314_s23, 3 }
  0x38   : > { %s1908_s12 = scalar_select %p1513_p9, 1, 0 }
  0x39   : > { %s1520_s27 = scalar_select %p153_p5, %s1278_s14, %s155_s29  }
  0x3a   : > { %1909 = sst [smem:[#allocation30_spill]] %s1908_s12  ;;  %216 = sbr.rel (%p981_p12) target bundleno = 119 (0x77), region = 16 }
  0x3b   : > { %1910 = sst [smem:[#allocation31_spill]] %s1520_s27 }
  0x41   : > { %s220_s30 = sand.u32 1, %s1302_s20   ;;  %s1011_s6 = sshll.u32 %s1310_s22, 11 }
  0x42   : > { %s982_s9 = sshll.u32 %s220_s30, 9  ;;  %s233_s7 = scalar_lea.hbm %s1872_s0, %s1011_s6 }
  0x43   : > { %s1015_s29 = scalar_select %p1436_p4, [#allocation0], [#allocation15] }
  0x44   : > { %s224_s27 = scalar_lea.vmem [#allocation2], %s982_s9  ;;  %s1316_s21 = smov 6144  }
  0x45   : > { %s246_s18 = sshll.u32 %s224_s27, 4  ;;  %s238_s5 = sld [smem:[%s1015_s29]]   ;;  %s247_s18 = int_to_ptr.vmem [resolvable:$true] %s246_s18 }
  0x46   : > { %1016 = sst [smem:[#allocation10]] (%p1436_p4), %s1316_s21  ;;  %s1317_s20 = smov 2048  }
  0x47   : > { %1017 = sst [smem:[#allocation10 + $0x1]] (%p1436_p4), %s1317_s20  ;;  %s1318_s22 = smov 8  }
  0x48   : > { %1018 = sst [smem:[#allocation10 + $0x2]] (%p1436_p4), %s1318_s22  ;;  %s1319_s10 = smov 256  }
  0x49   : > { %1019 = sst [smem:[#allocation10 + $0x3]] (%p1436_p4), %s1319_s10  ;;  %s1320_s9 = smov 16  }
  0x4a   : > { %1020 = sst [smem:[#allocation10 + $0x4]] (%p1436_p4), %s1319_s10  ;;  %s221_s6 = scalar_lea.sflag [#allocation3], %s220_s30 }
  0x4b   : > { %s985_s12 = sshll.u32 %s238_s5, 26  ;;  %1021 = sst [smem:[#allocation10 + $0x5]] (%p1436_p4), %s1320_s9 }
  0x4c   : > { %s986_s27 = sadd.s32 134217728, %s985_s12  ;;  %s1321_s15 = smov [#allocation9]  }
  0x4d   : > { %1022 = dma.general (%p1436_p4), %s233_s7, 8192, %s247_s18, %s221_s6, %s1321_s15, [#allocation10], %s986_s27, 0  }
  0x4e   : > { %s269_s20 = sand.u32 1, %s1314_s23   ;;  %s271_s21 = sand.u32 1, %s1290_s17  }
  0x4f   : > { %s987_s22 = sshll.u32 %s271_s21, 7  ;;  %s1012_s10 = sshll.u32 %s1936_s11, 11 }
  0x50   : > { %s296_s30 = scalar_lea.hbm %s1873_s1, %s1012_s10  ;;  %s273_s18 = scalar_lea.vmem [#allocation5], %s987_s22 }
  0x51   : > { %s1023_s28 = scalar_select %p1465_p10, [#allocation0], [#allocation16] }
  0x52   : > { %s309_s7 = sshll.u32 %s273_s18, 4  ;;  %s1322_s9 = smov 6144   ;;  %s310_s7 = int_to_ptr.vmem [resolvable:$true] %s309_s7 }
  0x53   : > { %s301_s12 = sld [smem:[%s1023_s28]]   ;;  %s1323_s27 = smov 512  }
  0x54   : > { %1024 = sst [smem:[#allocation12]] (%p1465_p10), %s1322_s9  ;;  %s1324_s6 = smov 2  }
  0x55   : > { %1025 = sst [smem:[#allocation12 + $0x1]] (%p1465_p10), %s1323_s27  ;;  %s1325_s11 = smov 256  }
  0x56   : > { %1026 = sst [smem:[#allocation12 + $0x2]] (%p1465_p10), %s1324_s6  ;;  %s1326_s21 = smov 16  }
  0x57   : > { %1027 = sst [smem:[#allocation12 + $0x3]] (%p1465_p10), %s1325_s11  ;;  %s1564_s10 = scalar_lea.sflag [#allocation6], %s269_s20 }
  0x58   : > { %1028 = sst [smem:[#allocation12 + $0x4]] (%p1465_p10), %s1325_s11  ;;  %s1327_s5 = smov [#allocation11]  }
  0x59   : > { %s993_s15 = sshll.u32 %s301_s12, 26  ;;  %1029 = sst [smem:[#allocation12 + $0x5]] (%p1465_p10), %s1326_s21 }
  0x5a   : > { %s994_s22 = sadd.s32 134217728, %s993_s15  ;;  %s334_s29 = sand.u32 1, %s1278_s14  }
  0x5b   : > { %1030 = dma.general (%p1465_p10), %s296_s30, 2048, %s310_s7, %s1564_s10, %s1327_s5, [#allocation12], %s994_s22, 0  }
  0x5c   : > { %s1013_s28 = sshll.u32 %s1940_s8, 11  ;;  %s995_s18 = sshll.u32 %s334_s29, 6 }
  0x5d   : > { %s882_s12 = scalar_lea.hbm %s1874_s2, %s1013_s28  ;;  %s336_s20 = scalar_lea.vmem [#allocation7], %s995_s18 }
  0x5e   : > { %s1574_s6 = scalar_lea.hbm %s882_s12, 1792  ;;  %s361_s11 = sshll.u32 %s336_s20, 4  ;;  %s1576_s11 = int_to_ptr.vmem [resolvable:$true] %s361_s11 }
  0x5f   : > { %s1203_s3 = scalar_lea.hbm %s882_s12, 2816  ;;  %s1179_s7 = scalar_lea.hbm %s1874_s2, 24576 }
  0x60   : > { %p1176_p1 = scmp.ne.s32.totalorder %s1574_s6, %s1203_s3  ;;  %p1180_p10 = scmp.lt.u32.totalorder %s1574_s6, %s1874_s2 }
  0x61   : > { %p1181_p11 = scmp.lt.u32.totalorder %s1179_s7, %s1203_s3  ;;  %p1183_p8 = scmp.lt.u32.totalorder %s1203_s3, %s1574_s6 }
  0x62   : > { %p1177_p3 = pnand %p1176_p1, %p1482_p0 }
  0x63   : > { %p1182_p13 = por %p1181_p11, %p1180_p10 }
  0x64   : > { %p1178_p4 = pneg %p1177_p3 }
  0x65   : > { %p1184_p5 = por %p1183_p8, %p1182_p13 }
  0x67   : > { %p1185_p12 = pnand %p1184_p5, %p1178_p4 }
  0x69   : > { %1188 = shalt.err (!%p1185_p12)
}
  0x6a   : > { %s1189_s22 = scalar_lea.vmem %s1576_s11, 1024  ;;  %s1328_s5 = smov [#allocation7]  }
  0x6b   : > { %p1190_p1 = scmp.ne.s32.totalorder %s1576_s11, %s1189_s22  ;;  %s1193_s29 = sshll.u32 %s1328_s5, 4  ;;  %s1194_s29 = int_to_ptr.vmem [resolvable:$false] %s1193_s29 }
  0x6c   : > { %s1195_s28 = scalar_lea.vmem %s1194_s29, 2048  ;;  %p1196_p6 = scmp.lt.s32.totalorder %s1576_s11, %s1194_s29 }
  0x6d   : > { %p1191_p3 = pnand %p1190_p1, %p1482_p0  ;;  %p1197_p2 = scmp.lt.s32.totalorder %s1195_s28, %s1189_s22 }
  0x6f   : > { %p1192_p9 = pneg %p1191_p3  ;;  %p1198_p10 = por %p1197_p2, %p1196_p6 }
  0x71   : > { %p1199_p11 = pnand %p1198_p10, %p1192_p9 }
  0x73   : > { %1202 = shalt.err (!%p1199_p11)
}
  0x74   : > { %s1329_s18 = smov 6144   ;;  %s1330_s9 = smov 256  }
  0x75   : > { %s1331_s27 = smov 16  }
  0x76   : > { %1031 = dma.hbm_to_vmem [thread:$0]  (%p1482_p0), %s1574_s6, 1024, %s1576_s11, %s1564_s10, %s1329_s18, %s1330_s9, %s1331_s27  }
  0x77 PF: > { %p1001_p4 = scmp.ge.s32.totalorder %s1314_s23, 1  ;;  %p369_p13 = scmp.lt.s32.totalorder %s1314_s23, 4 }
  0x79   : > { %p370_p8 = pnand %p1001_p4, %p369_p13 }
  0x7a   : > { %s1602_s12 = sand.u32 (!%p370_p8), 1, %s1298_s19  }
  0x7b   : > { %373 = sbr.rel (%p370_p8) target bundleno = 199 (0xc7), region = 32  ;;  %s1002_s20 = sshll.u32 (!%p370_p8), %s1602_s12, 9 }
  0x7c   : > { %s376_s3 = scalar_lea.sflag (!%p370_p8), [#allocation3], %s1602_s12  ;;  %s1606_s8 = scalar_lea.vmem (!%p370_p8), [#allocation2], %s1002_s20 }
  0x82   : > { %1253 = dma.done.wait (%p1449_p7), %s376_s3, 8192  }
  0x83   : > { %1255 = vsyncadd (%p1449_p7), %s376_s3, 4294959104  ;;  %s384_s25 = sand.u32 1, %s1420_s24   ;;  %s386_s10 = sand.u32 1, %s1286_s16  }
  0x84   : > { %s1003_s6 = sshll.u32 %s386_s10, 7  ;;  %s385_s11 = scalar_lea.sflag [#allocation6], %s384_s25 }
  0x85   : > { %s1614_s30 = scalar_lea.vmem [#allocation5], %s1003_s6  ;;  %p1911_p0 = scmp.ne.s32.totalorder %s1899_s26, 0 }
  0x87   : > { %1257 = dma.done.wait (%p1911_p0), %s385_s11, 2048  }
  0x88   : > { %1259 = vsyncadd (%p1911_p0), %s385_s11, 4294965248  ;;  %s1912_s7 = sld [smem:[#allocation28_spill]]  ;;  %s395_s15 = sand.u32 1, %s1274_s13  }
  0x89   : > { %s1004_s21 = sshll.u32 %s395_s15, 6 }
  0x8a   : > { %s1621_s4 = scalar_lea.vmem [#allocation7], %s1004_s21 }
  0x8e   : > { %p1913_p7 = scmp.ne.s32.totalorder %s1912_s7, 0 }
  0x90   : > { %1261 = dma.done.wait (%p1913_p7), %s385_s11, 1024  }
  0x91   : > { %1263 = vsyncadd (%p1913_p7), %s385_s11, 4294966272  ;;  %v550_v0 = vlaneseq  ;;  %v462_v3 = vld [vmem:[%s1606_s8] sm:$0xff]  ;;  %v463_v5 = vld [vmem:[%s1606_s8 + $0x8] sm:$0xff]  ;;  %s1642_s24 = scalar_lea.vmem [#allocation8], %s1002_s20  ;;  %s784_s26 = scalar_lea.sflag [#allocation4], %s1602_s12 }
  0x92   : > { %v526_v4 = vld [vmem:[%s1614_s30] sm:$0xff]  ;;  %v527_v7 = vld [vmem:[%s1614_s30 + $0x8] sm:$0xff]  ;;  %v464_v8 = vld [vmem:[%s1606_s8 + $0x10] sm:$0xff] }
  0x93   : > { %v1627_v1 = vshrl.u32 %v550_v0, 7  ;;  %v528_v9 = vld [vmem:[%s1614_s30 + $0x10] sm:$0xff]  ;;  %v465_v12 = vld [vmem:[%s1606_s8 + $0x18] sm:$0xff]  ;;  %v466_v14 = vld [vmem:[%s1606_s8 + $0x20] sm:$0xff] }
  0x94   : > { %v529_v13 = vld [vmem:[%s1614_s30 + $0x18] sm:$0xff]  ;;  %723 = vst [vmem:[%s1642_s24 + $0x20] sm:$0xff] %v466_v14  ;;  %v467_v16 = vld [vmem:[%s1606_s8 + $0x28] sm:$0xff]  ;;  %v468_v17 = vld [vmem:[%s1606_s8 + $0x30] sm:$0xff] }
  0x95   : > { %v1630_v2 = vadd.s32 8, %v1627_v1  ;;  %vm559_vm0 = vcmp.ge.s32.totalorder %v1627_v1, 1  ;;  %v469_v18 = vld [vmem:[%s1606_s8 + $0x38] sm:$0xff]  ;;  %724 = vst [vmem:[%s1642_s24 + $0x28] sm:$0xff] %v467_v16  ;;  %725 = vst [vmem:[%s1642_s24 + $0x30] sm:$0xff] %v468_v17  ;;  %v470_v19 = vld [vmem:[%s1606_s8 + $0x40] sm:$0xff] }
  0x96   : > { %v583_v6 = vsel %vm559_vm0, %v526_v4, %v462_v3  ;;  %v584_v10 = vsel %vm559_vm0, %v527_v7, %v463_v5  ;;  %726 = vst [vmem:[%s1642_s24 + $0x38] sm:$0xff] %v469_v18  ;;  %v471_v20 = vld [vmem:[%s1606_s8 + $0x48] sm:$0xff]  ;;  %v472_v21 = vld [vmem:[%s1606_s8 + $0x50] sm:$0xff]  ;;  %727 = vst [vmem:[%s1642_s24 + $0x40] sm:$0xff] %v470_v19 }
  0x97   : > { %vm568_vm1 = vcmp.le.s32.totalorder %v1630_v2, 8  ;;  %719 = vst [vmem:[%s1642_s24] sm:$0xff] %v583_v6  ;;  %720 = vst [vmem:[%s1642_s24 + $0x8] sm:$0xff] %v584_v10  ;;  %v473_v22 = vld [vmem:[%s1606_s8 + $0x58] sm:$0xff]  ;;  %v474_v23 = vld [vmem:[%s1606_s8 + $0x60] sm:$0xff] }
  0x98   : > { %v585_v11 = vsel %vm568_vm1, %v528_v9, %v464_v8  ;;  %v586_v15 = vsel %vm568_vm1, %v529_v13, %v465_v12  ;;  %728 = vst [vmem:[%s1642_s24 + $0x48] sm:$0xff] %v471_v20  ;;  %729 = vst [vmem:[%s1642_s24 + $0x50] sm:$0xff] %v472_v21  ;;  %v475_v24 = vld [vmem:[%s1606_s8 + $0x68] sm:$0xff]  ;;  %v542_v25 = vld [vmem:[%s1621_s4] sm:$0xff] }
  0x99   : > { %721 = vst [vmem:[%s1642_s24 + $0x10] sm:$0xff] %v585_v11  ;;  %722 = vst [vmem:[%s1642_s24 + $0x18] sm:$0xff] %v586_v15  ;;  %v543_v26 = vld [vmem:[%s1621_s4 + $0x8] sm:$0xff]  ;;  %v478_v27 = vld [vmem:[%s1606_s8 + $0x80] sm:$0xff] }
  0x9a   : > { %730 = vst [vmem:[%s1642_s24 + $0x58] sm:$0xff] %v473_v22  ;;  %731 = vst [vmem:[%s1642_s24 + $0x60] sm:$0xff] %v474_v23  ;;  %v530_v28 = vld [vmem:[%s1614_s30 + $0x20] sm:$0xff]  ;;  %v479_v29 = vld [vmem:[%s1606_s8 + $0x88] sm:$0xff] }
  0x9b   : > { %732 = vst [vmem:[%s1642_s24 + $0x68] sm:$0xff] %v475_v24  ;;  %733 = vst [vmem:[%s1642_s24 + $0x70] sm:$0xff] %v542_v25  ;;  %v531_v30 = vld [vmem:[%s1614_s30 + $0x28] sm:$0xff]  ;;  %v599_v31 = vsel %vm559_vm0, %v530_v28, %v478_v27  ;;  %v480_v33 = vld [vmem:[%s1606_s8 + $0x90] sm:$0xff] }
  0x9c   : > { %734 = vst [vmem:[%s1642_s24 + $0x78] sm:$0xff] %v543_v26  ;;  %v600_v32 = vsel %vm559_vm0, %v531_v30, %v479_v29  ;;  %v532_v34 = vld [vmem:[%s1614_s30 + $0x30] sm:$0xff]  ;;  %v481_v35 = vld [vmem:[%s1606_s8 + $0x98] sm:$0xff]  ;;  %735 = vst [vmem:[%s1642_s24 + $0x80] sm:$0xff] %v599_v31 }
  0x9d   : > { %736 = vst [vmem:[%s1642_s24 + $0x88] sm:$0xff] %v600_v32  ;;  %v601_v36 = vsel %vm568_vm1, %v532_v34, %v480_v33  ;;  %v533_v37 = vld [vmem:[%s1614_s30 + $0x38] sm:$0xff]  ;;  %v482_v38 = vld [vmem:[%s1606_s8 + $0xa0] sm:$0xff]  ;;  %v483_v39 = vld [vmem:[%s1606_s8 + $0xa8] sm:$0xff] }
  0x9e   : > { %737 = vst [vmem:[%s1642_s24 + $0x90] sm:$0xff] %v601_v36  ;;  %v602_v40 = vsel %vm568_vm1, %v533_v37, %v481_v35  ;;  %739 = vst [vmem:[%s1642_s24 + $0xa0] sm:$0xff] %v482_v38  ;;  %v484_v41 = vld [vmem:[%s1606_s8 + $0xb0] sm:$0xff]  ;;  %v485_v42 = vld [vmem:[%s1606_s8 + $0xb8] sm:$0xff] }
  0x9f   : > { %740 = vst [vmem:[%s1642_s24 + $0xa8] sm:$0xff] %v483_v39  ;;  %v486_v43 = vld [vmem:[%s1606_s8 + $0xc0] sm:$0xff]  ;;  %738 = vst [vmem:[%s1642_s24 + $0x98] sm:$0xff] %v602_v40  ;;  %v487_v44 = vld [vmem:[%s1606_s8 + $0xc8] sm:$0xff] }
  0xa0   : > { %741 = vst [vmem:[%s1642_s24 + $0xb0] sm:$0xff] %v484_v41  ;;  %742 = vst [vmem:[%s1642_s24 + $0xb8] sm:$0xff] %v485_v42  ;;  %v488_v45 = vld [vmem:[%s1606_s8 + $0xd0] sm:$0xff]  ;;  %v489_v46 = vld [vmem:[%s1606_s8 + $0xd8] sm:$0xff] }
  0xa1   : > { %743 = vst [vmem:[%s1642_s24 + $0xc0] sm:$0xff] %v486_v43  ;;  %744 = vst [vmem:[%s1642_s24 + $0xc8] sm:$0xff] %v487_v44  ;;  %v490_v47 = vld [vmem:[%s1606_s8 + $0xe0] sm:$0xff]  ;;  %v491_v48 = vld [vmem:[%s1606_s8 + $0xe8] sm:$0xff] }
  0xa2   : > { %745 = vst [vmem:[%s1642_s24 + $0xd0] sm:$0xff] %v488_v45  ;;  %746 = vst [vmem:[%s1642_s24 + $0xd8] sm:$0xff] %v489_v46  ;;  %v544_v49 = vld [vmem:[%s1621_s4 + $0x10] sm:$0xff]  ;;  %v545_v50 = vld [vmem:[%s1621_s4 + $0x18] sm:$0xff] }
  0xa3   : > { %747 = vst [vmem:[%s1642_s24 + $0xe0] sm:$0xff] %v490_v47  ;;  %748 = vst [vmem:[%s1642_s24 + $0xe8] sm:$0xff] %v491_v48  ;;  %v494_v51 = vld [vmem:[%s1606_s8 + $0x100] sm:$0xff]  ;;  %v495_v54 = vld [vmem:[%s1606_s8 + $0x108] sm:$0xff] }
  0xa4   : > { %749 = vst [vmem:[%s1642_s24 + $0xf0] sm:$0xff] %v544_v49  ;;  %v534_v52 = vld [vmem:[%s1614_s30 + $0x40] sm:$0xff]  ;;  %750 = vst [vmem:[%s1642_s24 + $0xf8] sm:$0xff] %v545_v50  ;;  %v535_v55 = vld [vmem:[%s1614_s30 + $0x48] sm:$0xff] }
  0xa5   : > { %v615_v53 = vsel %vm559_vm0, %v534_v52, %v494_v51  ;;  %v496_v56 = vld [vmem:[%s1606_s8 + $0x110] sm:$0xff]  ;;  %v616_v57 = vsel %vm559_vm0, %v535_v55, %v495_v54  ;;  %v497_v59 = vld [vmem:[%s1606_s8 + $0x118] sm:$0xff]  ;;  %v498_v63 = vld [vmem:[%s1606_s8 + $0x120] sm:$0xff] }
  0xa6   : > { %751 = vst [vmem:[%s1642_s24 + $0x100] sm:$0xff] %v615_v53  ;;  %v536_v58 = vld [vmem:[%s1614_s30 + $0x50] sm:$0xff]  ;;  %v537_v60 = vld [vmem:[%s1614_s30 + $0x58] sm:$0xff]  ;;  %752 = vst [vmem:[%s1642_s24 + $0x108] sm:$0xff] %v616_v57 }
  0xa7   : > { %v617_v61 = vsel %vm568_vm1, %v536_v58, %v496_v56  ;;  %v618_v62 = vsel %vm568_vm1, %v537_v60, %v497_v59  ;;  %v499_v0 = vld [vmem:[%s1606_s8 + $0x128] sm:$0xff]  ;;  %v500_v3 = vld [vmem:[%s1606_s8 + $0x130] sm:$0xff]  ;;  %755 = vst [vmem:[%s1642_s24 + $0x120] sm:$0xff] %v498_v63  ;;  %v501_v4 = vld [vmem:[%s1606_s8 + $0x138] sm:$0xff] }
  0xa8   : > { %753 = vst [vmem:[%s1642_s24 + $0x110] sm:$0xff] %v617_v61  ;;  %754 = vst [vmem:[%s1642_s24 + $0x118] sm:$0xff] %v618_v62  ;;  %v502_v5 = vld [vmem:[%s1606_s8 + $0x140] sm:$0xff]  ;;  %v503_v6 = vld [vmem:[%s1606_s8 + $0x148] sm:$0xff] }
  0xa9   : > { %756 = vst [vmem:[%s1642_s24 + $0x128] sm:$0xff] %v499_v0  ;;  %757 = vst [vmem:[%s1642_s24 + $0x130] sm:$0xff] %v500_v3  ;;  %v504_v7 = vld [vmem:[%s1606_s8 + $0x150] sm:$0xff]  ;;  %v505_v8 = vld [vmem:[%s1606_s8 + $0x158] sm:$0xff] }
  0xaa   : > { %758 = vst [vmem:[%s1642_s24 + $0x138] sm:$0xff] %v501_v4  ;;  %759 = vst [vmem:[%s1642_s24 + $0x140] sm:$0xff] %v502_v5  ;;  %v506_v9 = vld [vmem:[%s1606_s8 + $0x160] sm:$0xff]  ;;  %v507_v10 = vld [vmem:[%s1606_s8 + $0x168] sm:$0xff] }
  0xab   : > { %760 = vst [vmem:[%s1642_s24 + $0x148] sm:$0xff] %v503_v6  ;;  %761 = vst [vmem:[%s1642_s24 + $0x150] sm:$0xff] %v504_v7  ;;  %v546_v11 = vld [vmem:[%s1621_s4 + $0x20] sm:$0xff]  ;;  %v547_v12 = vld [vmem:[%s1621_s4 + $0x28] sm:$0xff] }
  0xac   : > { %762 = vst [vmem:[%s1642_s24 + $0x158] sm:$0xff] %v505_v8  ;;  %763 = vst [vmem:[%s1642_s24 + $0x160] sm:$0xff] %v506_v9  ;;  %v510_v13 = vld [vmem:[%s1606_s8 + $0x180] sm:$0xff]  ;;  %v511_v15 = vld [vmem:[%s1606_s8 + $0x188] sm:$0xff] }
  0xad   : > { %764 = vst [vmem:[%s1642_s24 + $0x168] sm:$0xff] %v507_v10  ;;  %765 = vst [vmem:[%s1642_s24 + $0x170] sm:$0xff] %v546_v11  ;;  %v538_v14 = vld [vmem:[%s1614_s30 + $0x60] sm:$0xff]  ;;  %v539_v17 = vld [vmem:[%s1614_s30 + $0x68] sm:$0xff] }
  0xae   : > { %766 = vst [vmem:[%s1642_s24 + $0x178] sm:$0xff] %v547_v12  ;;  %v631_v16 = vsel %vm559_vm0, %v538_v14, %v510_v13  ;;  %v512_v18 = vld [vmem:[%s1606_s8 + $0x190] sm:$0xff]  ;;  %v632_v20 = vsel %vm559_vm0, %v539_v17, %v511_v15  ;;  %v513_v22 = vld [vmem:[%s1606_s8 + $0x198] sm:$0xff]  ;;  %v514_v24 = vld [vmem:[%s1606_s8 + $0x1a0] sm:$0xff] }
  0xaf   : > { %v540_v19 = vld [vmem:[%s1614_s30 + $0x70] sm:$0xff]  ;;  %767 = vst [vmem:[%s1642_s24 + $0x180] sm:$0xff] %v631_v16  ;;  %v541_v23 = vld [vmem:[%s1614_s30 + $0x78] sm:$0xff]  ;;  %768 = vst [vmem:[%s1642_s24 + $0x188] sm:$0xff] %v632_v20 }
  0xb0   : > { %v633_v21 = vsel %vm568_vm1, %v540_v19, %v512_v18  ;;  %v634_v1 = vsel %vm568_vm1, %v541_v23, %v513_v22  ;;  %771 = vst [vmem:[%s1642_s24 + $0x1a0] sm:$0xff] %v514_v24  ;;  %v515_v25 = vld [vmem:[%s1606_s8 + $0x1a8] sm:$0xff]  ;;  %v516_v26 = vld [vmem:[%s1606_s8 + $0x1b0] sm:$0xff]  ;;  %v517_v27 = vld [vmem:[%s1606_s8 + $0x1b8] sm:$0xff] }
  0xb1   : > { %769 = vst [vmem:[%s1642_s24 + $0x190] sm:$0xff] %v633_v21  ;;  %770 = vst [vmem:[%s1642_s24 + $0x198] sm:$0xff] %v634_v1  ;;  %v518_v2 = vld [vmem:[%s1606_s8 + $0x1c0] sm:$0xff]  ;;  %v519_v28 = vld [vmem:[%s1606_s8 + $0x1c8] sm:$0xff] }
  0xb2   : > { %772 = vst [vmem:[%s1642_s24 + $0x1a8] sm:$0xff] %v515_v25  ;;  %773 = vst [vmem:[%s1642_s24 + $0x1b0] sm:$0xff] %v516_v26  ;;  %v520_v29 = vld [vmem:[%s1606_s8 + $0x1d0] sm:$0xff]  ;;  %v521_v30 = vld [vmem:[%s1606_s8 + $0x1d8] sm:$0xff] }
  0xb3   : > { %774 = vst [vmem:[%s1642_s24 + $0x1b8] sm:$0xff] %v517_v27  ;;  %775 = vst [vmem:[%s1642_s24 + $0x1c0] sm:$0xff] %v518_v2  ;;  %v522_v31 = vld [vmem:[%s1606_s8 + $0x1e0] sm:$0xff]  ;;  %v523_v32 = vld [vmem:[%s1606_s8 + $0x1e8] sm:$0xff] }
  0xb4   : > { %776 = vst [vmem:[%s1642_s24 + $0x1c8] sm:$0xff] %v519_v28  ;;  %777 = vst [vmem:[%s1642_s24 + $0x1d0] sm:$0xff] %v520_v29  ;;  %v548_v33 = vld [vmem:[%s1621_s4 + $0x30] sm:$0xff]  ;;  %v549_v34 = vld [vmem:[%s1621_s4 + $0x38] sm:$0xff] }
  0xb5   : > { %778 = vst [vmem:[%s1642_s24 + $0x1d8] sm:$0xff] %v521_v30  ;;  %779 = vst [vmem:[%s1642_s24 + $0x1e0] sm:$0xff] %v522_v31 }
  0xb6   : > { %780 = vst [vmem:[%s1642_s24 + $0x1e8] sm:$0xff] %v523_v32  ;;  %781 = vst [vmem:[%s1642_s24 + $0x1f0] sm:$0xff] %v548_v33 }
  0xb7   : > { %782 = vst [vmem:[%s1642_s24 + $0x1f8] sm:$0xff] %v549_v34 }
  0xb8   : > { %s1914_s22 = sld [smem:[#allocation23_spill]]  ;;  %s1915_s5 = sld [smem:[#allocation29_spill]] }
  0xb9   : > { %s816_s28 = sshll.u32 %s1642_s24, 4  ;;  %s1916_s27 = sld [smem:[#allocation32_spill]]  ;;  %s817_s28 = int_to_ptr.vmem [resolvable:$true] %s816_s28 }
  0xba   : > { %s1332_s3 = smov 2048   ;;  %s1333_s12 = smov 6144  }
  0xbb   : > { %s1334_s8 = smov 8   ;;  %s1335_s25 = smov 256  }
  0xbc   : > { %s1336_s10 = smov 16   ;;  %s1337_s6 = smov [#allocation13]  }
  0xbd   : > { %s1338_s11 = smov 0  }
  0xbe   : > { %s1014_s29 = sshll.u32 %s1914_s22, 11  ;;  %p1917_p2 = scmp.ne.s32.totalorder %s1915_s5, 0 }
  0xbf   : > { %s799_s20 = scalar_lea.hbm %s1916_s27, %s1014_s29 }
  0xc0   : > { %1035 = sst [smem:[#allocation14]] (%p1917_p2), %s1332_s3 }
  0xc1   : > { %1036 = sst [smem:[#allocation14 + $0x1]] (%p1917_p2), %s1333_s12 }
  0xc2   : > { %1037 = sst [smem:[#allocation14 + $0x2]] (%p1917_p2), %s1334_s8 }
  0xc3   : > { %1038 = sst [smem:[#allocation14 + $0x3]] (%p1917_p2), %s1335_s25 }
  0xc4   : > { %1039 = sst [smem:[#allocation14 + $0x4]] (%p1917_p2), %s1335_s25 }
  0xc5   : > { %1040 = sst [smem:[#allocation14 + $0x5]] (%p1917_p2), %s1336_s10 }
  0xc6   : > { %1041 = dma.general (%p1917_p2), %s817_s28, 8192, %s799_s20, %s784_s26, %s1337_s6, [#allocation14], %s1338_s11, 0  }
  0xc7 PF: > { %s1918_s30 = sld [smem:[#allocation21_spill]]  ;;  %s1919_s7 = sld [smem:[#allocation30_spill]] }
  0xc8   : > { %p1047_p6 = scmp.ge.s32.totalorder %s1314_s23, 2 }
  0xcd   : > { %s844_s15 = sand.u32 1, %s1918_s30   ;;  %p1920_p9 = scmp.ne.s32.totalorder %s1919_s7, 0 }
  0xce   : > { %s845_s21 = scalar_lea.sflag [#allocation4], %s844_s15 }
  0xcf   : > { %p1044_p5 = pnand %p1047_p6, %p1920_p9 }
  0xd1   : > { %1265 = dma.done.wait (!%p1044_p5), %s845_s21, 8192  }
  0xd2   : > { %1267 = vsyncadd (!%p1044_p5), %s845_s21, 4294959104  ;;  %s22_s23 = sadd.s32 1, %s1314_s23   ;;  %s1921_s4 = sld [smem:[#allocation31_spill]] }
  0xd3   : > { %p19_p12 = scmp.ge.s32.totalorder %s22_s23, 5   ;;  %s1922_s24 = sld [smem:[#allocation27_spill]] }
  0xd4   : > { %s1923_s26 = sld [smem:[#allocation22_spill]]  ;;  %s1924_s20 = sld [smem:[#allocation26_spill]] }
  0xd5   : > { %s1925_s21 = sld [smem:[#allocation24_spill]]  ;;  %s1926_s22 = sld [smem:[#allocation25_spill]] }
  0xd6   : > { %s1927_s12 = smov %s1274_s13  ;;  %s1928_s13 = smov %s1278_s14 }
  0xd7   : > { %s1930_s15 = smov %s1286_s16  ;;  %s1931_s16 = smov %s1290_s17 }
  0xd8   : > { %s1929_s14 = smov %s1921_s4  ;;  %s1933_s18 = smov %s1298_s19 }
  0xd9   : > { %s1932_s17 = smov %s1922_s24  ;;  %21 = sbr.rel (!%p19_p12) target bundleno = 13 (0xd), region = 116 }
  0xda   : > { %s1934_s19 = smov %s1923_s26 }
  0xe0   :  { %850 = vsyncpa [#allocation3], 1 }
  0xe1   :  { %852 = vsyncpa [#allocation3 + $0x1], 1 }
  0xe2   :  { %853 = vsyncpa [#allocation6], 1 }
  0xe3   :  { %855 = vsyncpa [#allocation6 + $0x1], 1 }
  0xe4   :  { %856 = vsyncpa [#allocation4], 1 }
  0xe5   :  { %858 = vsyncpa [#allocation4 + $0x1], 1 }

</bundles_post_ra>
